<compile_context>
chip_gen: v7x
topology: tpu7x:2x2x1
jax: 0.10.0
libtpu: 0.0.40
codegen_flags: <defaults>
</compile_context>

<pallas_src>
import functools

import jax
import jax.numpy as jnp
from jax.experimental import pallas as pl
from jax.experimental.pallas import tpu as pltpu

_LANE = 128


def _conv1x1_kernel(w_ref, x_ref, o_ref):
    # w_ref: (C_out, C_in)   -- resident in VMEM (same block every grid step)
    # x_ref: (C_in, TILE_M)  -- pixels on the lane dim (lane-dense)
    # o_ref: (C_out, TILE_M)
    o_ref[...] = jnp.dot(
        w_ref[...], x_ref[...], preferred_element_type=jnp.float32
    ).astype(o_ref.dtype)


def _pick_tile_m(m, c_in, c_out, itemsize):
    # Double-buffered x + out tiles must fit a conservative VMEM budget that is
    # valid on every generation (v5e 16 MiB scoped default, v7x 64 MiB physical
    # / 32 MiB scoped).  2 buffers per input tile + 2 per output tile.
    budget_bytes = 12 * 1024 * 1024
    per_row = 2 * (c_in + c_out) * itemsize
    t = budget_bytes // max(per_row, 1)
    t = max(_LANE, min(4096, (t // _LANE) * _LANE))
    if m <= t:
        return m  # full-extent block: always layout-legal, single tile per image
    return t      # multiple of 128 lanes; partial tail block handled by Pallas


def downsample_c(x_nchw, weight_oihw, stride):
    """Forward of DownsampleC: Conv2d(kernel_size=1, stride, padding=0, bias=False).

    x_nchw:      (N, C_in, H, W)
    weight_oihw: (C_out, C_in, 1, 1)   (PyTorch Conv2d weight layout)
    returns:     (N, C_out, H_out, W_out), H_out = floor((H-1)/stride)+1.
    """
    n, c_in, h, w = x_nchw.shape
    c_out = weight_oihw.shape[0]

    # (1) strided spatial subsampling (1x1 kernel, padding=0).  Channels stay
    #     leading -> no NCHW<->NHWC transposes anywhere.
    x_sub = x_nchw[:, :, ::stride, ::stride]          # (N, C_in, Ho, Wo)
    ho, wo = x_sub.shape[2], x_sub.shape[3]
    m = ho * wo

    x_mat = x_sub.reshape(n, c_in, m)                 # contiguous, free reshape
    w_mat = weight_oihw.reshape(c_out, c_in)          # (C_out, C_in)

    itemsize = jnp.dtype(x_nchw.dtype).itemsize
    t_m = _pick_tile_m(m, c_in, c_out, itemsize)
    grid = (n, pl.cdiv(m, t_m))

    cost = pl.CostEstimate(
        flops=2 * n * m * c_in * c_out,
        transcendentals=0,
        bytes_accessed=(n * m * (c_in + c_out) + c_in * c_out) * itemsize,
    )

    out_mat = pl.pallas_call(
        _conv1x1_kernel,
        out_shape=jax.ShapeDtypeStruct((n, c_out, m), x_nchw.dtype),
        grid_spec=pltpu.PrefetchScalarGridSpec(
            num_scalar_prefetch=0,
            grid=grid,
            in_specs=[
                # Weight: constant block index -> DMA'd once, stays resident.
                pl.BlockSpec((c_out, c_in), lambda b, i: (0, 0)),
                # Activations: (C_in, TILE_M) tiles, pixels on the lane dim.
                pl.BlockSpec((None, c_in, t_m), lambda b, i: (b, 0, i)),
            ],
            out_specs=pl.BlockSpec((None, c_out, t_m), lambda b, i: (b, 0, i)),
        ),
        compiler_params=pltpu.CompilerParams(
            dimension_semantics=("parallel", "parallel"),
            vmem_limit_bytes=32 * 1024 * 1024,
            # Let XLA fuse the strided slice/reshape producer into the
            # activation operand (input 1); weight (input 0) left as-is.
            allow_input_fusion=[False, True],
        ),
        cost_estimate=cost,
    )(w_mat, x_mat)

    # (N, C_out, M) -> (N, C_out, Ho, Wo): free reshape, no transpose.
    return out_mat.reshape(n, c_out, ho, wo)


if __name__ == "__main__":
    # DownsampleC(nIn=4, nOut=8, stride=2)
    n_in, n_out, stride = 4, 8, 2
    key = jax.random.PRNGKey(0)
    kx, kw = jax.random.split(key)

    x = jax.random.normal(kx, (2, n_in, 16, 16), dtype=jnp.float32)
    # Deterministic synthetic weight, Conv2d layout (C_out, C_in, 1, 1), no bias.
    weight = jax.random.normal(kw, (n_out, n_in, 1, 1), dtype=jnp.float32) * 0.1

    fwd = jax.jit(functools.partial(downsample_c, stride=stride))
    y = fwd(x, weight)
    jax.block_until_ready(y)

    # sanity: reference with plain JAX (strided 1x1 conv == subsample + matmul)
    ref = jnp.einsum(
        "nchw,oc->nohw", x[:, :, ::stride, ::stride], weight.reshape(n_out, n_in)
    )
    assert y.shape == (2, n_out, 8, 8), y.shape
    assert jnp.allclose(y, ref, atol=1e-5, rtol=1e-5)

    print("KERNEL_OK")
</pallas_src>

<mosaic_0001>
module attributes {stable_mosaic.version = 11 : i64} {
  func.func @_conv1x1_kernel(%arg0: i32, %arg1: i32, %arg2: memref<8x4xf32, #tpu.memory_space<vmem>>, %arg3: memref<1x4x64xf32, #tpu.memory_space<vmem>>, %arg4: memref<1x8x64xf32, #tpu.memory_space<vmem>>) attributes {dimension_semantics = [#tpu.dimension_semantics<parallel>, #tpu.dimension_semantics<parallel>], iteration_bounds = array<i64: 2, 1>, scalar_prefetch = 0 : i64, scratch_operands = 0 : i64, tpu.core_type = #tpu.core_type<tc>, window_params = [{pipeline_mode = #tpu.pipeline_mode<synchronous>, transform_indices = @transform_0, window_bounds = array<i64: 8, 4>}, {transform_indices = @transform_1, window_bounds = array<i64: 1, 4, 64>}, {transform_indices = @transform_2, window_bounds = array<i64: 1, 8, 64>}]} {
    %c0 = arith.constant 0 : index
    %c0_0 = arith.constant 0 : index
    %0 = vector.load %arg2[%c0, %c0_0] : memref<8x4xf32, #tpu.memory_space<vmem>>, vector<8x4xf32>
    %c0_1 = arith.constant 0 : index
    %c0_2 = arith.constant 0 : index
    %c0_3 = arith.constant 0 : index
    %1 = vector.load %arg3[%c0_1, %c0_2, %c0_3] : memref<1x4x64xf32, #tpu.memory_space<vmem>>, vector<1x4x64xf32>
    %2 = vector.shape_cast %1 : vector<1x4x64xf32> to vector<4x64xf32>
    %cst = arith.constant dense<0.000000e+00> : vector<8x64xf32>
    %3 = tpu.matmul %0, %2, %cst {dimension_numbers = #tpu.dot_dimension_numbers<[1], [0], [0], [1], [0, 0, 1, 1], [], []>} : vector<8x4xf32>, vector<4x64xf32>, vector<8x64xf32> -> vector<8x64xf32>
    %c0_4 = arith.constant 0 : index
    %c0_5 = arith.constant 0 : index
    %c0_6 = arith.constant 0 : index
    %4 = vector.load %arg4[%c0_4, %c0_5, %c0_6] : memref<1x8x64xf32, #tpu.memory_space<vmem>>, vector<1x8x64xf32>
    %5 = vector.shape_cast %4 : vector<1x8x64xf32> to vector<8x64xf32>
    %6 = vector.shape_cast %3 : vector<8x64xf32> to vector<1x8x64xf32>
    tpu.vector_store %arg4[%c0_4, %c0_5, %c0_6], %6 {strides = array<i32>} : memref<1x8x64xf32, #tpu.memory_space<vmem>>, vector<1x8x64xf32>,
    return
  }
  func.func @transform_0(%arg0: i32, %arg1: i32) -> (i32, i32) {
    %c0_i32 = arith.constant 0 : i32
    %c0_i32_0 = arith.constant 0 : i32
    %c0_i32_1 = arith.constant 0 : i32
    return %c0_i32, %c0_i32_0 : i32, i32
  }
  func.func @transform_1(%arg0: i32, %arg1: i32) -> (i32, i32, i32) {
    %c0_i32 = arith.constant 0 : i32
    %c0_i32_0 = arith.constant 0 : i32
    return %arg0, %c0_i32, %arg1 : i32, i32, i32
  }
  func.func @transform_2(%arg0: i32, %arg1: i32) -> (i32, i32, i32) {
    %c0_i32 = arith.constant 0 : i32
    %c0_i32_0 = arith.constant 0 : i32
    return %arg0, %c0_i32, %arg1 : i32, i32, i32
  }
}

</mosaic_0001>

<bundles_post_ra>
// kernel: downsample_c.1
= control target key start
LH: loop header
LB: loop body
LE: loop exit
PB: predicated region body
PF: predicated region fallthrough
CT: control target
= control target key end

     0   :  { %s411_s9 = smov 0   ;;  %s413_s10 = smov 0   ;;  %s444_s0 = inlined_call_operand.vmem [shape: f32[8,4], index: 0, kind: input, shape index: {}]   ;;  %s445_s1 = inlined_call_operand.vmem [shape: f32[2,4,64], index: 1, kind: input, shape index: {}]   ;;  %s446_s2 = inlined_call_operand.vmem [shape: f32[2,8,64], index: 2, kind: output, shape index: {}]  }
   0x1   :  { %s415_s11 = smov 0  }
   0x2 LB: > { %s24_s12 = sadd.s32 1, %s388_s10  ;;  %p330_p0 = scmp.ge.s32.totalorder %s392_s11, 1  ;;  %s392_s11 = sphi %s415_s11, %s12_s11   ;;  %s388_s10 = sphi %s413_s10, %s448_s10   ;;  %s384_s9 = sphi %s411_s9, %s447_s9  }
   0x3   : > { %p26_p1 = scmp.ge.s32.totalorder %s24_s12, 2  ;;  %p130_p2 = scmp.lt.s32.totalorder %s392_s11, 3 }
   0x5   : > { %s450_s12 = smov (%p26_p1, %s24_s12), 0  ;;  %p131_p3 = pnand %p330_p0, %p130_p2 }
   0x6   : > { %p156_p4 = scmp.lt.s32.totalorder (!%p131_p3), %s384_s9, 1  ;;  %v394_v0 = vmov (!%p131_p3), 0.0   ;;  %vm395_vm0 = vmmov (!%p131_p3), 0   ;;  %vm176_vm1 = vcmask (!%p131_p3), 1043456   ;;  %v170_v1 = vld [vmem:[%s444_s0] sm:$0xff] (!%p131_p3)  ;;  %vm172_vm2 = vcmask (!%p131_p3), 31744  }
   0x7   : > { %134 = sbr.rel (%p131_p3) target bundleno = 232 (0xe8), region = 28  ;;  %339 = vmatprep.subr.mxu0 (!%p131_p3), %v394_v0  ;;  %341 = vmatprep.mubr.msk.f32.mxu0 (!%p131_p3), %vm395_vm0, %v394_v0  ;;  %vm250_vm3 = vcmask (!%p131_p3), 523264  }
   0xe   : > { %s452_s9 = smov (!%p156_p4, %s384_s9), 1 }
   0xf   : > { %s331_s13 = sshll.u32 %s452_s9, 2  ;;  %s332_s19 = sshll.u32 %s452_s9, 3 }
  0x10   : > { %s162_s16 = scalar_lea.vmem %s445_s1, %s331_s13  ;;  %s169_s22 = scalar_lea.vmem %s446_s2, %s332_s19 }
  0x11   : > { %v171_v2 = vld [vmem:[%s162_s16] sm:$0xf] }
  0x12   : > { %340 = vmatpush3.msk.msra.mxu0 %vm176_vm1, %v171_v2 }
  0x13   : > { %342 = vmatmul.mubr.msk.f32.vlgmr.msra.gmra.mrb[0].mxu0 %vm172_vm2, %v170_v1 }
  0xe6   : > { %v246_v3 = vpop.f32.mrb[0].mxu0 }
  0xe7   : > { %251 = vst.msk [vmem:[%s169_s22] sm:$0xff] %vm250_vm3, %v246_v3  ;;  %v343_v4 = vpop.f32.mrb[1].mxu0 }
  0xe8 PF: > { %s12_s11 = sadd.s32 1, %s392_s11   ;;  %s447_s9 = smov %s388_s10 }
  0xe9   : > { %p9_p5 = scmp.ge.s32.totalorder %s12_s11, 4   ;;  %s448_s10 = smov %s450_s12 }
  0xeb   :  { %11 = sbr.rel (!%p9_p5) target bundleno = 2 (0x2), region = 58 }

</bundles_post_ra>
